<compile_context>
chip_gen: v7x
topology: tpu7x:2x2x1
jax: 0.10.0
libtpu: 0.0.40
codegen_flags: <defaults>
</compile_context>

<pallas_src>
import numpy as np
import jax
import jax.numpy as jnp
from jax.experimental import pallas as pl
from jax.experimental.pallas import tpu as pltpu


def _up2_rows_padded(size):
    """(2*size + 2, size) bilinear x2 (align_corners=False) interp matrix.

    Rows 1 .. 2*size hold interpolation weights for outputs 0 .. 2*size-1;
    rows 0 and 2*size+1 are all-zero, which implements the subsequent
    3x3 / padding=1 conv's zero padding for free.
    """
    m = np.zeros((2 * size + 2, size), dtype=np.float32)
    for o in range(2 * size):
        src = min(max((o + 0.5) * 0.5 - 0.5, 0.0), float(size - 1))
        i0 = int(np.floor(src))
        i1 = min(i0 + 1, size - 1)
        f = src - float(i0)
        m[o + 1, i0] += 1.0 - f
        m[o + 1, i1] += f
    return m


def _fused_up_conv_bn_relu_kernel(x_ref, uh_ref, m_ref, shift_ref, o_ref):
    # x_ref     : VMEM (1, H, Cin*W)        one sample, H-major, Cin packed on lanes
    # uh_ref    : VMEM (3, H2, H)           kh-shifted bilinear row-interp (zero-pad rows)
    # m_ref     : VMEM (3, Cin*W, Cout*W2)  col-interp * conv-weight * BN-scale, kw folded
    # shift_ref : VMEM (1, Cout*W2)         per-channel shift, repeated along W2 lanes
    # o_ref     : VMEM (1, H2, Cout*W2)     packed, lane-dense output tile
    x = x_ref[0]                                       # (H, Cin*W)
    acc = None
    for kh in range(3):                                # static unroll: 6 MXU pushes total
        t = jnp.dot(uh_ref[kh], x,
                    preferred_element_type=jnp.float32)        # (H2, Cin*W)
        p = jnp.dot(t, m_ref[kh],
                    preferred_element_type=jnp.float32)        # (H2, Cout*W2)
        acc = p if acc is None else acc + p
    # Epilogue: BN/bias shift + ReLU, single lane-dense store.
    o_ref[0] = jnp.maximum(acc + shift_ref[...], 0.0)


def upsample_forward(x, params, eps=1e-5):
    """bilinear x2 -> Conv2d(3x3, pad=1) -> BatchNorm2d(eval) -> ReLU (NCHW)."""
    N, Cin, H, W = x.shape
    w = params["conv_w"]                      # (Cout, Cin, 3, 3)
    b = params["conv_b"]                      # (Cout,)
    Cout, Cin_w, KH, KW = w.shape
    assert Cin_w == Cin
    # The +1 zero rows/cols in the interp matrices encode padding=1 for a 3x3 kernel.
    assert (KH, KW) == (3, 3), "zero-pad folding assumes a 3x3 kernel with padding=1"
    H2, W2 = 2 * H, 2 * W

    # Fold BN (eval mode, running stats) into conv weights / bias.
    scale = params["bn_gamma"] / jnp.sqrt(params["bn_var"] + eps)             # (Cout,)
    w_f = (w * scale[:, None, None, None]).astype(jnp.float32)                # (Cout,Cin,3,3)
    shift = ((b - params["bn_mean"]) * scale + params["bn_beta"]).astype(jnp.float32)

    # Bilinear x2 interp matrices with zero padding rows/cols.
    uh_full = jnp.asarray(_up2_rows_padded(H))                                # (H2+2, H)
    uw_full = jnp.asarray(_up2_rows_padded(W)).T                              # (W, W2+2)
    # Three kh-shifted row matrices (vertical conv taps), precomputed on host.
    uh3 = jnp.stack([uh_full[kh:kh + H2, :] for kh in range(3)], axis=0)      # (3, H2, H)
    # Fold kw shifts + conv weights + BN scale into block matrices M[kh]:
    #   M[kh][ci*W + j, co*W2 + v] = sum_kw w_f[co,ci,kh,kw] * uw_full[j, kw+v]
    uw3 = jnp.stack([uw_full[:, kw:kw + W2] for kw in range(3)], axis=1)      # (W, 3, W2)
    m = jnp.einsum("oihk,jkv->hijov", w_f, uw3,
                   precision=jax.lax.Precision.HIGHEST)
    m = m.reshape(3, Cin * W, Cout * W2)                                      # (3,Cin*W,Cout*W2)
    shift_row = jnp.repeat(shift, W2)[None, :]                                # (1, Cout*W2)

    # H-major input so all Cin channels ride one matmul (tiny host-side transpose).
    x_t = x.astype(jnp.float32).transpose(0, 2, 1, 3).reshape(N, H, Cin * W)

    out_packed = pl.pallas_call(
        _fused_up_conv_bn_relu_kernel,
        out_shape=jax.ShapeDtypeStruct((N, H2, Cout * W2), jnp.float32),
        grid_spec=pltpu.PrefetchScalarGridSpec(
            num_scalar_prefetch=0,
            grid=(N,),
            in_specs=[
                pl.BlockSpec((1, H, Cin * W), lambda n: (n, 0, 0)),
                pl.BlockSpec((3, H2, H), lambda n: (0, 0, 0)),
                pl.BlockSpec((3, Cin * W, Cout * W2), lambda n: (0, 0, 0)),
                pl.BlockSpec((1, Cout * W2), lambda n: (0, 0)),
            ],
            out_specs=pl.BlockSpec((1, H2, Cout * W2), lambda n: (n, 0, 0)),
        ),
        compiler_params=pltpu.CompilerParams(
            dimension_semantics=("parallel",),
            vmem_limit_bytes=32 * 1024 * 1024,
        ),
    )(x_t, uh3, m, shift_row)

    # Untangle the lane-packed channel layout back to NCHW (64 KiB, XLA side).
    return out_packed.reshape(N, H2, Cout, W2).transpose(0, 2, 1, 3)


# ----------------------------------------------------------------------------
# Pure-JAX reference (independent formulation) for correctness checking only.
# ----------------------------------------------------------------------------
def bilinear_up2x_ref(x):
    N, C, H, W = x.shape

    def idx_weights(size):
        out = jnp.arange(2 * size, dtype=jnp.float32)
        src = jnp.clip((out + 0.5) * 0.5 - 0.5, 0.0, float(size - 1))
        i0 = jnp.floor(src).astype(jnp.int32)
        i1 = jnp.minimum(i0 + 1, size - 1)
        w1 = src - i0.astype(jnp.float32)
        return i0, i1, 1.0 - w1, w1

    hi0, hi1, hw0, hw1 = idx_weights(H)
    wi0, wi1, ww0, ww1 = idx_weights(W)
    xr = (x[:, :, hi0, :] * hw0[None, None, :, None]
          + x[:, :, hi1, :] * hw1[None, None, :, None])
    return (xr[:, :, :, wi0] * ww0[None, None, None, :]
            + xr[:, :, :, wi1] * ww1[None, None, None, :])


def upsample_forward_ref(x, params, eps=1e-5):
    xu = bilinear_up2x_ref(x)
    y = jax.lax.conv_general_dilated(
        xu, params["conv_w"], window_strides=(1, 1), padding=((1, 1), (1, 1)),
        dimension_numbers=("NCHW", "OIHW", "NCHW"),
        precision=jax.lax.Precision.HIGHEST)
    y = y + params["conv_b"][None, :, None, None]
    scale = params["bn_gamma"] / jnp.sqrt(params["bn_var"] + eps)
    y = (y - params["bn_mean"][None, :, None, None]) * scale[None, :, None, None] \
        + params["bn_beta"][None, :, None, None]
    return jnp.maximum(y, 0.0)


if __name__ == "__main__":
    key = jax.random.PRNGKey(0)
    N, Cin, H, W = 2, 4, 16, 16
    Cout = 8

    k = jax.random.split(key, 7)
    x = jax.random.normal(k[0], (N, Cin, H, W), dtype=jnp.float32)
    params = {
        "conv_w": 0.1 * jax.random.normal(k[1], (Cout, Cin, 3, 3), jnp.float32),
        "conv_b": 0.05 * jax.random.normal(k[2], (Cout,), jnp.float32),
        "bn_gamma": 1.0 + 0.1 * jax.random.normal(k[3], (Cout,), jnp.float32),
        "bn_beta": 0.1 * jax.random.normal(k[4], (Cout,), jnp.float32),
        "bn_mean": 0.1 * jax.random.normal(k[5], (Cout,), jnp.float32),
        "bn_var": jnp.abs(1.0 + 0.1 * jax.random.normal(k[6], (Cout,), jnp.float32)),
    }
    # TODO(synk): nn.Dropout(0.2) treated as identity (eval mode / use_dropout=False);
    # BatchNorm uses eval (running-stats) semantics folded into the matmul weights.

    out = jax.jit(upsample_forward)(x, params)
    out = jax.block_until_ready(out)

    ref = upsample_forward_ref(x, params)
    assert out.shape == (N, Cout, 2 * H, 2 * W)
    # Tightened vs. the previous 2e-3 (all-f32 pipeline; review correctness note).
    assert jnp.allclose(out, ref, atol=1e-4, rtol=1e-4)

    print("KERNEL_OK")
</pallas_src>

<mosaic_0001>
module attributes {stable_mosaic.version = 11 : i64} {
  func.func @_fused_up_conv_bn_relu_kernel(%arg0: i32, %arg1: memref<1x16x64xf32, #tpu.memory_space<vmem>>, %arg2: memref<3x32x16xf32, #tpu.memory_space<vmem>>, %arg3: memref<3x64x256xf32, #tpu.memory_space<vmem>>, %arg4: memref<1x256xf32, #tpu.memory_space<vmem>>, %arg5: memref<1x32x256xf32, #tpu.memory_space<vmem>>) attributes {dimension_semantics = [#tpu.dimension_semantics<parallel>], iteration_bounds = array<i64: 2>, scalar_prefetch = 0 : i64, scratch_operands = 0 : i64, tpu.core_type = #tpu.core_type<tc>, window_params = [{transform_indices = @transform_0, window_bounds = array<i64: 1, 16, 64>}, {pipeline_mode = #tpu.pipeline_mode<synchronous>, transform_indices = @transform_1, window_bounds = array<i64: 3, 32, 16>}, {pipeline_mode = #tpu.pipeline_mode<synchronous>, transform_indices = @transform_2, window_bounds = array<i64: 3, 64, 256>}, {pipeline_mode = #tpu.pipeline_mode<synchronous>, transform_indices = @transform_3, window_bounds = array<i64: 1, 256>}, {transform_indices = @transform_4, window_bounds = array<i64: 1, 32, 256>}]} {
    %c0 = arith.constant 0 : index
    %c0_0 = arith.constant 0 : index
    %c0_1 = arith.constant 0 : index
    %0 = vector.load %arg1[%c0, %c0_0, %c0_1] : memref<1x16x64xf32, #tpu.memory_space<vmem>>, vector<1x16x64xf32>
    %1 = vector.shape_cast %0 : vector<1x16x64xf32> to vector<16x64xf32>
    %c0_2 = arith.constant 0 : index
    %c0_3 = arith.constant 0 : index
    %c0_4 = arith.constant 0 : index
    %2 = vector.load %arg2[%c0_2, %c0_3, %c0_4] : memref<3x32x16xf32, #tpu.memory_space<vmem>>, vector<1x32x16xf32>
    %3 = vector.shape_cast %2 : vector<1x32x16xf32> to vector<32x16xf32>
    %cst = arith.constant dense<0.000000e+00> : vector<32x64xf32>
    %4 = tpu.matmul %3, %1, %cst {dimension_numbers = #tpu.dot_dimension_numbers<[1], [0], [0], [1], [0, 0, 1, 1], [], []>} : vector<32x16xf32>, vector<16x64xf32>, vector<32x64xf32> -> vector<32x64xf32>
    %c0_5 = arith.constant 0 : index
    %c0_6 = arith.constant 0 : index
    %c0_7 = arith.constant 0 : index
    %5 = vector.load %arg3[%c0_5, %c0_6, %c0_7] : memref<3x64x256xf32, #tpu.memory_space<vmem>>, vector<1x64x256xf32>
    %6 = vector.shape_cast %5 : vector<1x64x256xf32> to vector<64x256xf32>
    %cst_8 = arith.constant dense<0.000000e+00> : vector<32x256xf32>
    %7 = tpu.matmul %4, %6, %cst_8 {dimension_numbers = #tpu.dot_dimension_numbers<[1], [0], [0], [1], [0, 0, 1, 1], [], []>} : vector<32x64xf32>, vector<64x256xf32>, vector<32x256xf32> -> vector<32x256xf32>
    %c1 = arith.constant 1 : index
    %c0_9 = arith.constant 0 : index
    %c0_10 = arith.constant 0 : index
    %8 = vector.load %arg2[%c1, %c0_9, %c0_10] : memref<3x32x16xf32, #tpu.memory_space<vmem>>, vector<1x32x16xf32>
    %9 = vector.shape_cast %8 : vector<1x32x16xf32> to vector<32x16xf32>
    %cst_11 = arith.constant dense<0.000000e+00> : vector<32x64xf32>
    %10 = tpu.matmul %9, %1, %cst_11 {dimension_numbers = #tpu.dot_dimension_numbers<[1], [0], [0], [1], [0, 0, 1, 1], [], []>} : vector<32x16xf32>, vector<16x64xf32>, vector<32x64xf32> -> vector<32x64xf32>
    %c1_12 = arith.constant 1 : index
    %c0_13 = arith.constant 0 : index
    %c0_14 = arith.constant 0 : index
    %11 = vector.load %arg3[%c1_12, %c0_13, %c0_14] : memref<3x64x256xf32, #tpu.memory_space<vmem>>, vector<1x64x256xf32>
    %12 = vector.shape_cast %11 : vector<1x64x256xf32> to vector<64x256xf32>
    %cst_15 = arith.constant dense<0.000000e+00> : vector<32x256xf32>
    %13 = tpu.matmul %10, %12, %cst_15 {dimension_numbers = #tpu.dot_dimension_numbers<[1], [0], [0], [1], [0, 0, 1, 1], [], []>} : vector<32x64xf32>, vector<64x256xf32>, vector<32x256xf32> -> vector<32x256xf32>
    %14 = arith.addf %7, %13 : vector<32x256xf32>
    %c2 = arith.constant 2 : index
    %c0_16 = arith.constant 0 : index
    %c0_17 = arith.constant 0 : index
    %15 = vector.load %arg2[%c2, %c0_16, %c0_17] : memref<3x32x16xf32, #tpu.memory_space<vmem>>, vector<1x32x16xf32>
    %16 = vector.shape_cast %15 : vector<1x32x16xf32> to vector<32x16xf32>
    %cst_18 = arith.constant dense<0.000000e+00> : vector<32x64xf32>
    %17 = tpu.matmul %16, %1, %cst_18 {dimension_numbers = #tpu.dot_dimension_numbers<[1], [0], [0], [1], [0, 0, 1, 1], [], []>} : vector<32x16xf32>, vector<16x64xf32>, vector<32x64xf32> -> vector<32x64xf32>
    %c2_19 = arith.constant 2 : index
    %c0_20 = arith.constant 0 : index
    %c0_21 = arith.constant 0 : index
    %18 = vector.load %arg3[%c2_19, %c0_20, %c0_21] : memref<3x64x256xf32, #tpu.memory_space<vmem>>, vector<1x64x256xf32>
    %19 = vector.shape_cast %18 : vector<1x64x256xf32> to vector<64x256xf32>
    %cst_22 = arith.constant dense<0.000000e+00> : vector<32x256xf32>
    %20 = tpu.matmul %17, %19, %cst_22 {dimension_numbers = #tpu.dot_dimension_numbers<[1], [0], [0], [1], [0, 0, 1, 1], [], []>} : vector<32x64xf32>, vector<64x256xf32>, vector<32x256xf32> -> vector<32x256xf32>
    %21 = arith.addf %14, %20 : vector<32x256xf32>
    %c0_23 = arith.constant 0 : index
    %c0_24 = arith.constant 0 : index
    %22 = vector.load %arg4[%c0_23, %c0_24] : memref<1x256xf32, #tpu.memory_space<vmem>>, vector<1x256xf32>
    %23 = vector.broadcast %22 : vector<1x256xf32> to vector<32x256xf32>
    %24 = arith.addf %21, %23 : vector<32x256xf32>
    %cst_25 = arith.constant 0.000000e+00 : f32
    %25 = vector.broadcast %cst_25 : f32 to vector<32x256xf32>
    %26 = arith.maximumf %24, %25 : vector<32x256xf32>
    %c0_26 = arith.constant 0 : index
    %c0_27 = arith.constant 0 : index
    %c0_28 = arith.constant 0 : index
    %27 = vector.load %arg5[%c0_26, %c0_27, %c0_28] : memref<1x32x256xf32, #tpu.memory_space<vmem>>, vector<1x32x256xf32>
    %28 = vector.shape_cast %27 : vector<1x32x256xf32> to vector<32x256xf32>
    %29 = vector.shape_cast %26 : vector<32x256xf32> to vector<1x32x256xf32>
    tpu.vector_store %arg5[%c0_26, %c0_27, %c0_28], %29 {strides = array<i32>} : memref<1x32x256xf32, #tpu.memory_space<vmem>>, vector<1x32x256xf32>,
    return
  }
  func.func @transform_0(%arg0: i32) -> (i32, i32, i32) {
    %c0_i32 = arith.constant 0 : i32
    %c0_i32_0 = arith.constant 0 : i32
    %c0_i32_1 = arith.constant 0 : i32
    return %arg0, %c0_i32, %c0_i32_0 : i32, i32, i32
  }
  func.func @transform_1(%arg0: i32) -> (i32, i32, i32) {
    %c0_i32 = arith.constant 0 : i32
    %c0_i32_0 = arith.constant 0 : i32
    %c0_i32_1 = arith.constant 0 : i32
    %c0_i32_2 = arith.constant 0 : i32
    return %c0_i32, %c0_i32_0, %c0_i32_1 : i32, i32, i32
  }
  func.func @transform_2(%arg0: i32) -> (i32, i32, i32) {
    %c0_i32 = arith.constant 0 : i32
    %c0_i32_0 = arith.constant 0 : i32
    %c0_i32_1 = arith.constant 0 : i32
    %c0_i32_2 = arith.constant 0 : i32
    return %c0_i32, %c0_i32_0, %c0_i32_1 : i32, i32, i32
  }
  func.func @transform_3(%arg0: i32) -> (i32, i32) {
    %c0_i32 = arith.constant 0 : i32
    %c0_i32_0 = arith.constant 0 : i32
    %c0_i32_1 = arith.constant 0 : i32
    return %c0_i32, %c0_i32_0 : i32, i32
  }
  func.func @transform_4(%arg0: i32) -> (i32, i32, i32) {
    %c0_i32 = arith.constant 0 : i32
    %c0_i32_0 = arith.constant 0 : i32
    %c0_i32_1 = arith.constant 0 : i32
    return %arg0, %c0_i32, %c0_i32_0 : i32, i32, i32
  }
}

</mosaic_0001>

<bundles_post_ra>
// kernel: upsample_forward.1
= control target key start
LH: loop header
LB: loop body
LE: loop exit
PB: predicated region body
PF: predicated region fallthrough
CT: control target
= control target key end

     0   :  { %s1203_s15 = smov 0   ;;  %s1461_s0 = inlined_call_operand.vmem [shape: f32[2,16,64], index: 0, kind: input, shape index: {}]   ;;  %s1462_s1 = inlined_call_operand.vmem [shape: f32[3,32,16], index: 1, kind: input, shape index: {}]   ;;  %s1463_s2 = inlined_call_operand.vmem [shape: f32[3,64,256], index: 2, kind: input, shape index: {}]   ;;  %s1464_s3 = inlined_call_operand.vmem [shape: f32[1,256], index: 3, kind: input, shape index: {}]   ;;  %s1465_s4 = inlined_call_operand.vmem [shape: f32[2,32,256], index: 4, kind: output, shape index: {}]  }
   0x1 LB: > { %s959_s16 = sadd.s32 4294967295, %s1175_s15   ;;  %p963_p0 = scmp.ge.s32.totalorder %s1175_s15, 1  ;;  %s1175_s15 = sphi %s1203_s15, %s14_s15  }
   0x2   : > { %p162_p1 = scmp.lt.s32.totalorder %s1175_s15, 3 }
   0x4   : > { %p163_p2 = pnand %p963_p0, %p162_p1 }
   0x5   : > { %p188_p3 = scmp.lt.s32.totalorder (!%p163_p2), %s959_s16, 1  ;;  %vm204_vm0 = vcmask (!%p163_p2), 130048   ;;  %v972_v0 = vld [vmem:[%s1462_s1 + $0x20] sm:$0xff] (!%p163_p2)  ;;  %v981_v1 = vld [vmem:[%s1463_s2 + $0x88] sm:$0xff] (!%p163_p2)  ;;  %v983_v2 = vld [vmem:[%s1463_s2 + $0x98] sm:$0xff] (!%p163_p2)  ;;  %v1177_v33 = vmov (!%p163_p2), 0.0  }
   0x6   : > { %166 = sbr.rel (%p163_p2) target bundleno = 697 (0x2b9), region = 36  ;;  %1068 = vmatprep.mubr.msk.f32.mxu1 (!%p163_p2), %vm204_vm0, %v972_v0  ;;  %v200_v3 = vld [vmem:[%s1462_s1] sm:$0xff] (!%p163_p2)  ;;  %v1092_v7 = vpack.c.bf16 (!%p163_p2), %v983_v2, %v981_v1  ;;  %v982_v9 = vld [vmem:[%s1463_s2 + $0x90] sm:$0xff] (!%p163_p2)  ;;  %v985_v10 = vld [vmem:[%s1463_s2 + $0xa8] sm:$0xff] (!%p163_p2)  ;;  %vm437_vm1 = vcmask (!%p163_p2), 523264  }
   0x7   : > { %1058 = vmatprep.mubr.msk.f32.mxu0 (!%p163_p2), %vm204_vm0, %v200_v3  ;;  %v980_v8 = vld [vmem:[%s1463_s2 + $0x80] sm:$0xff] (!%p163_p2)  ;;  %v987_v11 = vld [vmem:[%s1463_s2 + $0xb8] sm:$0xff] (!%p163_p2)  ;;  %v973_v12 = vld [vmem:[%s1462_s1 + $0x28] sm:$0xff] (!%p163_p2) }
   0x8   : > { %v1094_v13 = vpack.c.bf16 (!%p163_p2), %v982_v9, %v980_v8  ;;  %v201_v14 = vld [vmem:[%s1462_s1 + $0x8] sm:$0xff] (!%p163_p2)  ;;  %v974_v15 = vld [vmem:[%s1462_s1 + $0x30] sm:$0xff] (!%p163_p2)  ;;  %v1096_v16 = vpack.c.bf16 (!%p163_p2), %v987_v11, %v985_v10  ;;  %v984_v17 = vld [vmem:[%s1463_s2 + $0xa0] sm:$0xff] (!%p163_p2) }
   0x9   : > { %v986_v18 = vld [vmem:[%s1463_s2 + $0xb0] sm:$0xff] (!%p163_p2)  ;;  %v989_v19 = vld [vmem:[%s1463_s2 + $0xc8] sm:$0xff] (!%p163_p2)  ;;  %v991_v20 = vld [vmem:[%s1463_s2 + $0xd8] sm:$0xff] (!%p163_p2) }
   0xa   : > { %v975_v21 = vld [vmem:[%s1462_s1 + $0x38] sm:$0xff] (!%p163_p2)  ;;  %v1098_v22 = vpack.c.bf16 (!%p163_p2), %v986_v18, %v984_v17  ;;  %v1100_v23 = vpack.c.bf16 (!%p163_p2), %v991_v20, %v989_v19  ;;  %v988_v24 = vld [vmem:[%s1463_s2 + $0xc0] sm:$0xff] (!%p163_p2)  ;;  %v990_v25 = vld [vmem:[%s1463_s2 + $0xd0] sm:$0xff] (!%p163_p2) }
   0xb   : > { %v993_v26 = vld [vmem:[%s1463_s2 + $0xe8] sm:$0xff] (!%p163_p2)  ;;  %v995_v27 = vld [vmem:[%s1463_s2 + $0xf8] sm:$0xff] (!%p163_p2)  ;;  %v1102_v28 = vpack.c.bf16 (!%p163_p2), %v990_v25, %v988_v24  ;;  %v992_v30 = vld [vmem:[%s1463_s2 + $0xe0] sm:$0xff] (!%p163_p2) }
   0xc   : > { %v1104_v29 = vpack.c.bf16 (!%p163_p2), %v995_v27, %v993_v26  ;;  %v994_v31 = vld [vmem:[%s1463_s2 + $0xf0] sm:$0xff] (!%p163_p2)  ;;  %v203_v35 = vld [vmem:[%s1462_s1 + $0x18] sm:$0xff] (!%p163_p2)  ;;  %v303_v36 = vld [vmem:[%s1463_s2 + $0x8] sm:$0xff] (!%p163_p2) }
   0xd   : > { %s1467_s16 = smov (!%p188_p3, %s959_s16), 1  ;;  %v1106_v32 = vpack.c.bf16 %v994_v31, %v992_v30  ;;  %v202_v34 = vld [vmem:[%s1462_s1 + $0x10] sm:$0xff]  ;;  %v305_v37 = vld [vmem:[%s1463_s2 + $0x18] sm:$0xff]  ;;  %v302_v38 = vld [vmem:[%s1463_s2] sm:$0xff] }
   0xe   : > { %s1034_s19 = sshll.u32 %s1467_s16, 4  ;;  %v1108_v39 = vpack.c.bf16 %v305_v37, %v303_v36  ;;  %v304_v40 = vld [vmem:[%s1463_s2 + $0x10] sm:$0xff]  ;;  %v307_v41 = vld [vmem:[%s1463_s2 + $0x28] sm:$0xff]  ;;  %v309_v42 = vld [vmem:[%s1463_s2 + $0x38] sm:$0xff]  ;;  %s1035_s23 = sshll.u32 %s1467_s16, 6 }
   0xf   : > { %s192_s26 = scalar_lea.vmem %s1461_s0, %s1034_s19  ;;  %v1110_v43 = vpack.c.bf16 %v304_v40, %v302_v38  ;;  %v1112_v44 = vpack.c.bf16 %v309_v42, %v307_v41  ;;  %v306_v45 = vld [vmem:[%s1463_s2 + $0x20] sm:$0xff]  ;;  %v308_v46 = vld [vmem:[%s1463_s2 + $0x30] sm:$0xff]  ;;  %v311_v47 = vld [vmem:[%s1463_s2 + $0x48] sm:$0xff] }
  0x10   : > { %v198_v4 = vld [vmem:[%s192_s26] sm:$0xff]  ;;  %v199_v5 = vld [vmem:[%s192_s26 + $0x8] sm:$0xff]  ;;  %v313_v48 = vld [vmem:[%s1463_s2 + $0x58] sm:$0xff]  ;;  %v1114_v49 = vpack.c.bf16 %v308_v46, %v306_v45  ;;  %v870_v45 = vlaneseq  ;;  %s1448_s26 = scalar_lea.vmem %s1465_s4, %s1035_s23 }
  0x11   : > { %v1231_v6 = vpack.c.bf16 %v199_v5, %v198_v4  ;;  %v1116_v50 = vpack.c.bf16 %v313_v48, %v311_v47  ;;  %v310_v51 = vld [vmem:[%s1463_s2 + $0x40] sm:$0xff]  ;;  %v312_v52 = vld [vmem:[%s1463_s2 + $0x50] sm:$0xff]  ;;  %v315_v53 = vld [vmem:[%s1463_s2 + $0x68] sm:$0xff] }
  0x12   : > { %v317_v54 = vld [vmem:[%s1463_s2 + $0x78] sm:$0xff]  ;;  %v1118_v55 = vpack.c.bf16 %v312_v52, %v310_v51  ;;  %v314_v57 = vld [vmem:[%s1463_s2 + $0x60] sm:$0xff]  ;;  %v316_v58 = vld [vmem:[%s1463_s2 + $0x70] sm:$0xff]  ;;  %v871_v46 = vshrl.u32 %v870_v45, 7 }
  0x13   : > { %1089 = vmatprep.subr.bf16.mxu1 %v1231_v6  ;;  %1085 = vmatprep.subr.bf16.mxu0 %v1231_v6  ;;  %v1120_v56 = vpack.c.bf16 %v317_v54, %v315_v53  ;;  %v1122_v59 = vpack.c.bf16 %v316_v58, %v314_v57  ;;  %v1004_v2 = vld [vmem:[%s1462_s1 + $0x40] sm:$0xff]  ;;  %v1005_v3 = vld [vmem:[%s1462_s1 + $0x48] sm:$0xff]  ;;  %v1006_v4 = vld [vmem:[%s1462_s1 + $0x50] sm:$0xff] }
  0x14   : > { %1091 = vmatpush3.bf16.msra.mxu1 %v1231_v6  ;;  %1087 = vmatpush3.bf16.msra.mxu0 %v1231_v6  ;;  %v1007_v5 = vld [vmem:[%s1462_s1 + $0x58] sm:$0xff]  ;;  %v1012_v9 = vld [vmem:[%s1463_s2 + $0x100] sm:$0xff]  ;;  %v1014_v10 = vld [vmem:[%s1463_s2 + $0x110] sm:$0xff]  ;;  %v872_v47 = vsub.s32 0, %v871_v46 }
  0x15   : > { %1093 = vmatprep.subr.bf16.mxu1 %v1092_v7  ;;  %1109 = vmatprep.subr.bf16.mxu0 %v1108_v39  ;;  %v1015_v7 = vld [vmem:[%s1463_s2 + $0x118] sm:$0xff]  ;;  %v1130_v11 = vpack.c.bf16 %v1014_v10, %v1012_v9  ;;  %v1016_v17 = vld [vmem:[%s1463_s2 + $0x120] sm:$0xff]  ;;  %v1018_v18 = vld [vmem:[%s1463_s2 + $0x130] sm:$0xff] }
  0x16   : > { %v1134_v19 = vpack.c.bf16 %v1018_v18, %v1016_v17  ;;  %v1021_v20 = vld [vmem:[%s1463_s2 + $0x148] sm:$0xff]  ;;  %v1022_v24 = vld [vmem:[%s1463_s2 + $0x150] sm:$0xff]  ;;  %v1027_v27 = vld [vmem:[%s1463_s2 + $0x178] sm:$0xff] }
  0x17   : > { %1069 = vmatmul.mubr.msk.f32.vlgmr.msra.gmra.mrb[0].mxu1 %vm204_vm0, %v973_v12  ;;  %1059 = vmatmul.mubr.msk.f32.vlgmr.msra.gmra.mrb[0].mxu0 %vm204_vm0, %v201_v14  ;;  %v1019_v14 = vld [vmem:[%s1463_s2 + $0x138] sm:$0xff]  ;;  %v1025_v26 = vld [vmem:[%s1463_s2 + $0x168] sm:$0xff]  ;;  %v1026_v30 = vld [vmem:[%s1463_s2 + $0x170] sm:$0xff] }
  0x18   : > { %1071 = vmatprep.mubr.msk.f32.mxu1 %vm204_vm0, %v974_v15  ;;  %1095 = vmatpush1.bf16.msra.mxu1 %v1094_v13  ;;  %v1017_v13 = vld [vmem:[%s1463_s2 + $0x128] sm:$0xff]  ;;  %v868_v48 = vld [vmem:[%s1464_s3] sm:$0x3] }
  0x19   : > { %1097 = vmatprep.subr.bf16.mxu1 %v1096_v16  ;;  %1061 = vmatprep.mubr.msk.f32.mxu0 %vm204_vm0, %v202_v34  ;;  %v1132_v16 = vpack.c.bf16 %v1019_v14, %v1017_v13 }
  0x1a   : > { %1111 = vmatpush1.bf16.msra.mxu0 %v1110_v43 }
  0x1b   : > { %1072 = vmatmul.mubr.msk.f32.gmra.mrb[2].mxu1 %vm204_vm0, %v975_v21  ;;  %1062 = vmatmul.mubr.msk.f32.gmra.mrb[2].mxu0 %vm204_vm0, %v203_v35  ;;  %v1023_v21 = vld [vmem:[%s1463_s2 + $0x158] sm:$0xff] }
  0x1c   : > { %1099 = vmatpush1.bf16.msra.mxu1 %v1098_v22  ;;  %514 = vmatprep.mubr.f32.mxu1 %v1177_v33  ;;  %v1136_v22 = vpack.c.bf16 %v1023_v21, %v1021_v20 }
  0x1d   : > { %1101 = vmatprep.subr.bf16.mxu1 %v1100_v23  ;;  %615 = vmatprep.mubr.f32.mxu0 %v1177_v33  ;;  %v1020_v23 = vld [vmem:[%s1463_s2 + $0x140] sm:$0xff] }
  0x1e   : > { %1113 = vmatprep.subr.bf16.mxu0 %v1112_v44  ;;  %v1138_v25 = vpack.c.bf16 %v1022_v24, %v1020_v23 }
  0x1f   : > { %1115 = vmatpush1.bf16.msra.mxu0 %v1114_v49  ;;  %v876_v49 = vsub.s32 1, %v871_v46 }
  0x20   : > { %1103 = vmatpush1.bf16.msra.mxu1 %v1102_v28  ;;  %1117 = vmatprep.subr.bf16.mxu0 %v1116_v50  ;;  %v1140_v28 = vpack.c.bf16 %v1027_v27, %v1025_v26  ;;  %v873_v50 = vrot.slane %v868_v48, %v872_v47 }
  0x21   : > { %1105 = vmatprep.subr.bf16.mxu1 %v1104_v29  ;;  %v1024_v29 = vld [vmem:[%s1463_s2 + $0x160] sm:$0xff]  ;;  %v877_v52 = vrot.slane %v868_v48, %v876_v49 }
  0x22   : > { %v1142_v31 = vpack.c.bf16 %v1026_v30, %v1024_v29 }
  0x23   : > { %1119 = vmatpush1.bf16.msra.mxu0 %v1118_v55 }
  0x24   : > { %1107 = vmatpush1.bf16.msra.mxu1 %v1106_v32  ;;  %1121 = vmatprep.subr.bf16.mxu0 %v1120_v56 }
  0x25   : > { %1125 = vmatprep.subr.bf16.mxu1 %v1231_v6 }
  0x27   : > { %1123 = vmatpush1.bf16.msra.mxu0 %v1122_v59 }
  0xea   : > { %v1070_v60 = vpop.f32.mrb[0].mxu1  ;;  %v1060_v61 = vpop.f32.mrb[0].mxu0 }
  0xeb   : > { %v401_v62 = vpop.f32.mrb[1].mxu1  ;;  %v283_v63 = vpop.f32.mrb[1].mxu0 }
  0xec   : > { %996 = vmatmul.mubr.msk.f32.vlgmr.msra.gmra.mrb[4].mxu1 %vm437_vm1, %v401_v62  ;;  %1000 = vmatmul.mubr.msk.f32.vlgmr.msra.gmra.mrb[4].mxu0 %vm437_vm1, %v283_v63 }
  0xed   : > { %1127 = vmatpush3.bf16.msra.mxu1 %v1231_v6  ;;  %520 = vmatprep.mubr.f32.mxu1 %v1177_v33  ;;  %v1013_v6 = vld [vmem:[%s1463_s2 + $0x108] sm:$0xff] }
  0xee   : > { %v1073_v0 = vpop.f32.mrb[2].mxu1  ;;  %621 = vmatprep.mubr.f32.mxu0 %v1177_v33  ;;  %v1128_v8 = vpack.c.bf16 %v1015_v7, %v1013_v6  ;;  %v1063_v12 = vpop.f32.mrb[2].mxu0 }
  0xef   : > { %v411_v1 = vpop.f32.mrb[3].mxu1  ;;  %v293_v15 = vpop.f32.mrb[3].mxu0 }
  0xf0   : > { %997 = vmatmul.mubr.msk.f32.gmra.mrb[6].mxu1 %vm437_vm1, %v1070_v60  ;;  %1001 = vmatmul.mubr.msk.f32.gmra.mrb[6].mxu0 %vm437_vm1, %v1060_v61 }
  0xf1   : > { %526 = vmatprep.mubr.f32.mxu1 %v1177_v33  ;;  %627 = vmatprep.mubr.f32.mxu0 %v1177_v33 }
  0xf2   : > { %1129 = vmatprep.subr.bf16.mxu0 %v1128_v8 }
  0xf3   : > { %1131 = vmatpush1.bf16.msra.mxu0 %v1130_v11 }
  0xf4   : > { %998 = vmatmul.mubr.msk.f32.gmra.mrb[8].mxu1 %vm437_vm1, %v411_v1  ;;  %1002 = vmatmul.mubr.msk.f32.gmra.mrb[8].mxu0 %vm437_vm1, %v293_v15 }
  0xf5   : > { %532 = vmatprep.mubr.f32.mxu1 %v1177_v33  ;;  %1133 = vmatprep.subr.bf16.mxu0 %v1132_v16 }
  0xf6   : > { %633 = vmatprep.mubr.f32.mxu0 %v1177_v33 }
  0xf7   : > { %1135 = vmatpush1.bf16.msra.mxu0 %v1134_v19 }
  0xf8   : > { %999 = vmatmul.mubr.msk.f32.gmra.mrb[10].mxu1 %vm437_vm1, %v1073_v0  ;;  %1003 = vmatmul.mubr.msk.f32.gmra.mrb[10].mxu0 %vm437_vm1, %v1063_v12 }
  0xf9   : > { %1078 = vmatprep.mubr.msk.f32.mxu1 %vm204_vm0, %v1004_v2  ;;  %1137 = vmatprep.subr.bf16.mxu0 %v1136_v22 }
  0xfa   : > { %835 = vmatprep.mubr.f32.mxu0 %v1177_v33 }
  0xfb   : > { %1139 = vmatpush1.bf16.msra.mxu0 %v1138_v25 }
  0xfc   : > { %1079 = vmatmul.mubr.msk.f32.vlgmr.msra.gmra.mrb[12].mxu1 %vm204_vm0, %v1005_v3  ;;  %1141 = vmatprep.subr.bf16.mxu0 %v1140_v28 }
  0xfd   : > { %1081 = vmatprep.mubr.msk.f32.mxu1 %vm204_vm0, %v1006_v4 }
  0xff   : > { %1143 = vmatpush1.bf16.msra.mxu0 %v1142_v31 }
 0x100   : > { %1082 = vmatmul.mubr.msk.f32.gmra.mrb[14].mxu1 %vm204_vm0, %v1007_v5 }
 0x1bf   : > { %v516_v32 = vpop.f32.mrb[4].mxu1 }
 0x1c0   : > { %v518_v34 = vpop.f32.mrb[5].mxu1 }
 0x1c3   : > { %v522_v35 = vpop.f32.mrb[6].mxu1 }
 0x1c4   : > { %v524_v36 = vpop.f32.mrb[7].mxu1 }
 0x1c7   : > { %v528_v37 = vpop.f32.mrb[8].mxu1 }
 0x1c8   : > { %v530_v38 = vpop.f32.mrb[9].mxu1 }
 0x1cb   : > { %v534_v39 = vpop.f32.mrb[10].mxu1 }
 0x1cc   : > { %v536_v40 = vpop.f32.mrb[11].mxu1 }
 0x1cf   : > { %v1080_v41 = vpop.f32.mrb[12].mxu1 }
 0x1d0   : > { %v723_v42 = vpop.f32.mrb[13].mxu1 }
 0x1d1   : > { %1028 = vmatmul.mubr.msk.f32.vlgmr.msra.gmra.mrb[4].mxu0 %vm437_vm1, %v723_v42 }
 0x1d2   : > { %841 = vmatprep.mubr.f32.mxu0 %v1177_v33 }
 0x1d3   : > { %v1083_v43 = vpop.f32.mrb[14].mxu1 }
 0x1d4   : > { %v733_v44 = vpop.f32.mrb[15].mxu1 }
 0x1d5   : > { %1029 = vmatmul.mubr.msk.f32.gmra.mrb[6].mxu0 %vm437_vm1, %v1080_v41 }
 0x1d6   : > { %847 = vmatprep.mubr.f32.mxu0 %v1177_v33 }
 0x1d9   : > { %1030 = vmatmul.mubr.msk.f32.gmra.mrb[8].mxu0 %vm437_vm1, %v733_v44 }
 0x1da   : > { %853 = vmatprep.mubr.f32.mxu0 %v1177_v33 }
 0x1dd   : > { %1031 = vmatmul.mubr.msk.f32.gmra.mrb[10].mxu0 %vm437_vm1, %v1083_v43 }
 0x2a4   : > { %v837_v51 = vpop.f32.mrb[4].mxu0 }
 0x2a5   : > { %v1144_v53 = vadd.f32 %v837_v51, %v516_v32  ;;  %v839_v54 = vpop.f32.mrb[5].mxu0 }
 0x2a6   : > { %v1145_v55 = vadd.f32 %v839_v54, %v518_v34 }
 0x2a7   : > { %v880_v56 = vadd.f32 %v1144_v53, %v873_v50 }
 0x2a8   : > { %v881_v33 = vadd.f32 %v1145_v55, %v877_v52  ;;  %v843_v57 = vpop.f32.mrb[6].mxu0 }
 0x2a9   : > { %v888_v58 = vmax.f32 %v880_v56, 0.0  ;;  %v1146_v59 = vadd.f32 %v843_v57, %v522_v35  ;;  %v845_v60 = vpop.f32.mrb[7].mxu0 }
 0x2aa   : > { %v889_v61 = vmax.f32 %v881_v33, 0.0  ;;  %v1147_v62 = vadd.f32 %v845_v60, %v524_v36 }
 0x2ab   : > { %896 = vst [vmem:[%s1448_s26] sm:$0xff] %v888_v58  ;;  %v882_v63 = vadd.f32 %v1146_v59, %v873_v50 }
 0x2ac   : > { %897 = vst [vmem:[%s1448_s26 + $0x8] sm:$0xff] %v889_v61  ;;  %v883_v0 = vadd.f32 %v1147_v62, %v877_v52  ;;  %v849_v1 = vpop.f32.mrb[8].mxu0 }
 0x2ad   : > { %v890_v2 = vmax.f32 %v882_v63, 0.0  ;;  %v1148_v3 = vadd.f32 %v849_v1, %v528_v37  ;;  %v851_v4 = vpop.f32.mrb[9].mxu0 }
 0x2ae   : > { %v891_v5 = vmax.f32 %v883_v0, 0.0  ;;  %v1149_v6 = vadd.f32 %v851_v4, %v530_v38 }
 0x2af   : > { %898 = vst [vmem:[%s1448_s26 + $0x10] sm:$0xff] %v890_v2  ;;  %v884_v7 = vadd.f32 %v1148_v3, %v873_v50 }
 0x2b0   : > { %899 = vst [vmem:[%s1448_s26 + $0x18] sm:$0xff] %v891_v5  ;;  %v885_v8 = vadd.f32 %v1149_v6, %v877_v52  ;;  %v855_v9 = vpop.f32.mrb[10].mxu0 }
 0x2b1   : > { %v892_v10 = vmax.f32 %v884_v7, 0.0  ;;  %v1150_v11 = vadd.f32 %v855_v9, %v534_v39  ;;  %v857_v12 = vpop.f32.mrb[11].mxu0 }
 0x2b2   : > { %v893_v13 = vmax.f32 %v885_v8, 0.0  ;;  %v1151_v14 = vadd.f32 %v857_v12, %v536_v40 }
 0x2b3   : > { %900 = vst [vmem:[%s1448_s26 + $0x20] sm:$0xff] %v892_v10  ;;  %v886_v15 = vadd.f32 %v1150_v11, %v873_v50 }
 0x2b4   : > { %901 = vst [vmem:[%s1448_s26 + $0x28] sm:$0xff] %v893_v13  ;;  %v887_v16 = vadd.f32 %v1151_v14, %v877_v52 }
 0x2b5   : > { %v894_v17 = vmax.f32 %v886_v15, 0.0 }
 0x2b6   : > { %v895_v18 = vmax.f32 %v887_v16, 0.0 }
 0x2b7   : > { %902 = vst [vmem:[%s1448_s26 + $0x30] sm:$0xff] %v894_v17 }
 0x2b8   : > { %903 = vst [vmem:[%s1448_s26 + $0x38] sm:$0xff] %v895_v18 }
 0x2b9 PF: > { %s14_s15 = sadd.s32 1, %s1175_s15  }
 0x2ba   : > { %p11_p4 = scmp.ge.s32.totalorder %s14_s15, 4  }
 0x2bc   :  { %13 = sbr.rel (!%p11_p4) target bundleno = 1 (0x1), region = 70 }

</bundles_post_ra>
